<compile_context>
chip_gen: v5e
topology: v5e:2x2
jax: 0.10.0
libtpu: 0.0.40
codegen_flags: <defaults>
</compile_context>

<pallas_src>
import functools

import jax
import jax.numpy as jnp
from jax.experimental import pallas as pl
from jax.experimental.pallas import tpu as pltpu


def _round_up(x, m):
    return (x + m - 1) // m * m


def _pick_tile_h(hp, max_th):
    """Largest multiple of 128 dividing hp, <= max_th, and < hp when hp >= 256
    (guarantees >= 2 hidden tiles for megacore sharding at small batch)."""
    best = 128
    th = 128
    while th <= min(hp, max_th):
        if hp % th == 0 and (th < hp or hp == 128):
            best = th
        th += 128
    return best


def _sigmoid(v):
    # sigmoid(x) == 0.5 * tanh(0.5 * x) + 0.5  -> one EUP op per element.
    return 0.5 * jnp.tanh(0.5 * v) + 0.5


def _lstm_cell_kernel(x_ref, h_ref, wx_ref, wh_ref, b_ref, c_ref,
                      h_out_ref, c_out_ref):
    # Two MXU dots accumulating into the same f32 gates (no fused-LHS concat).
    gates = jnp.dot(x_ref[...], wx_ref[...],
                    preferred_element_type=jnp.float32)
    gates += jnp.dot(h_ref[...], wh_ref[...],
                     preferred_element_type=jnp.float32)
    gates += b_ref[...]                              # folded bias (1, 4*TH)

    th = h_out_ref.shape[1]                          # lane-aligned tile width
    i_t = _sigmoid(gates[:, 0 * th:1 * th])
    f_t = _sigmoid(gates[:, 1 * th:2 * th])
    g_t = jnp.tanh(gates[:, 2 * th:3 * th])
    o_t = _sigmoid(gates[:, 3 * th:4 * th])

    c_out = c_ref[...] * f_t + i_t * g_t             # c carried in f32
    c_out_ref[...] = c_out
    h_out_ref[...] = (o_t * jnp.tanh(c_out)).astype(h_out_ref.dtype)


def prepare_lstm_params(w_i, b_i, w_h, b_h, *, compute_dtype=jnp.bfloat16,
                        max_tile_h=None):
    """One-time packing of PyTorch-layout LSTMCell parameters.

    w_i: (4H, input_size)  b_i: (4H,)
    w_h: (4H, H)           b_h: (4H,)
    Returns a dict with wx (input_size, 4*Hp), wh (Hp, 4*Hp), bias (1, 4*Hp)
    f32, plus static metadata (hidden_size, hidden_pad, tile_h, compute_dtype).
    Columns are re-ordered per hidden tile as [i, f, g, o] so every gate slice
    inside the kernel is a lane-aligned static slice.
    """
    four_h, input_size = w_i.shape
    H = four_h // 4
    Hp = _round_up(H, 128)
    itemsize = jnp.dtype(compute_dtype).itemsize
    if max_tile_h is None:
        # bf16 weights stream at half the bytes -> wider slabs are affordable;
        # f32 capped at 256 so double-buffered slabs fit v5e/v7x scoped VMEM.
        max_tile_h = 512 if itemsize <= 2 else 256
    th = _pick_tile_h(Hp, max_tile_h)
    n_tiles = Hp // th

    def pack_cols(w_t):
        # (rows, 4H) gate-major -> per-hidden-tile [i,f,g,o] column order,
        # zero-padded to Hp.
        rows = w_t.shape[0]
        w4 = w_t.reshape(rows, 4, H)
        w4 = jnp.pad(w4, ((0, 0), (0, 0), (0, Hp - H)))
        return (w4.reshape(rows, 4, n_tiles, th)
                  .transpose(0, 2, 1, 3)
                  .reshape(rows, 4 * Hp)).astype(compute_dtype)

    wx = pack_cols(jnp.transpose(w_i))                          # (in, 4*Hp)
    wh_t = jnp.pad(jnp.transpose(w_h), ((0, Hp - H), (0, 0)))   # (Hp, 4H)
    wh = pack_cols(wh_t)                                        # (Hp, 4*Hp)

    bias = (b_i.astype(jnp.float32) + b_h.astype(jnp.float32)).reshape(4, H)
    bias = jnp.pad(bias, ((0, 0), (0, Hp - H)))
    bias = (bias.reshape(4, n_tiles, th)
                .transpose(1, 0, 2)
                .reshape(1, 4 * Hp))
    return {"wx": wx, "wh": wh, "bias": bias,
            "hidden_size": H, "hidden_pad": Hp, "tile_h": th,
            "compute_dtype": jnp.dtype(compute_dtype)}


@functools.partial(jax.jit, static_argnames=("tile_h", "max_tile_b"))
def lstm_cell_step_padded(x_pad, h_pad, c_pad, wx, wh, bias, *,
                          tile_h, max_tile_b=128):
    """One LSTM cell step on padded operands (the fast recurrent path).

    x_pad: (Bp, input_size) compute dtype
    h_pad: (Bp, Hp)         compute dtype
    c_pad: (Bp, Hp)         float32
    Returns (h_pad_out, c_pad_out) in the same padded layout/dtypes, so a
    recurrence has no per-step concat / pad / slice HBM round-trips.
    """
    Bp, in_size = x_pad.shape
    Hp = wh.shape[0]
    TH = tile_h
    # NOTE: 256 is a better max_tile_b on v6e/v7x (2x256x256 MXU) when B>=256;
    # 128 is the safe default (fills the 128-wide v5e MXU).
    TB = min(max_tile_b, Bp)
    while Bp % TB:
        TB -= 8
    n_j = Hp // TH
    n_b = Bp // TB

    wbytes = wx.dtype.itemsize
    abytes = x_pad.dtype.itemsize
    # Double-buffered footprint of every block (weights, LHS, bias, c, outs).
    est = 2 * (TB * in_size * abytes + TB * Hp * abytes
               + in_size * 4 * TH * wbytes + Hp * 4 * TH * wbytes
               + 4 * TH * 4
               + TB * TH * 4
               + TB * TH * abytes + TB * TH * 4)
    vmem_limit = min(max(int(est * 1.5) + (1 << 20), 32 << 20), 64 << 20)

    h_out, c_out = pl.pallas_call(
        _lstm_cell_kernel,
        out_shape=(
            jax.ShapeDtypeStruct((Bp, Hp), h_pad.dtype),
            jax.ShapeDtypeStruct((Bp, Hp), jnp.float32),
        ),
        grid=(n_j, n_b),       # batch is the fast axis -> weight slab resident
        in_specs=[
            pl.BlockSpec((TB, in_size), lambda j, b: (b, 0)),      # x tile
            pl.BlockSpec((TB, Hp), lambda j, b: (b, 0)),           # h tile
            pl.BlockSpec((in_size, 4 * TH), lambda j, b: (0, j)),  # Wx slab
            pl.BlockSpec((Hp, 4 * TH), lambda j, b: (0, j)),       # Wh slab
            pl.BlockSpec((1, 4 * TH), lambda j, b: (0, j)),        # bias slab
            pl.BlockSpec((TB, TH), lambda j, b: (b, j)),           # c_in (f32)
        ],
        out_specs=(
            pl.BlockSpec((TB, TH), lambda j, b: (b, j)),           # h_out
            pl.BlockSpec((TB, TH), lambda j, b: (b, j)),           # c_out (f32)
        ),
        input_output_aliases={5: 1},                               # c_in -> c_out
        compiler_params=pltpu.CompilerParams(
            dimension_semantics=("parallel", "parallel"),
            vmem_limit_bytes=vmem_limit),
    )(x_pad, h_pad, wx, wh, bias, c_pad)
    return h_out, c_out


def pad_lstm_state(x, h, c, params, *, max_tile_b=128):
    """Pad/cast (x, h, c) into the padded layout expected by the fast path."""
    B = x.shape[0]
    H = params["hidden_size"]
    Hp = params["hidden_pad"]
    cdt = params["compute_dtype"]
    TB = min(max_tile_b, _round_up(B, 8))
    Bp = _round_up(B, TB)
    x_pad = jnp.pad(x.astype(cdt), ((0, Bp - B), (0, 0)))
    h_pad = jnp.pad(h.astype(cdt), ((0, Bp - B), (0, Hp - H)))
    c_pad = jnp.pad(c.astype(jnp.float32), ((0, Bp - B), (0, Hp - H)))
    return x_pad, h_pad, c_pad


def lstm_cell_forward(x, h_c_in, params):
    """Mirrors LSTMCell.forward: returns (h_out, c_out) of shape (B, H)."""
    B = x.shape[0]
    H = params["hidden_size"]
    if h_c_in is None:
        z = jnp.zeros((B, H), x.dtype)
        h_c_in = (z, z)
    h_in, c_in = h_c_in
    x_pad, h_pad, c_pad = pad_lstm_state(x, h_in, c_in, params)
    h_out, c_out = lstm_cell_step_padded(
        x_pad, h_pad, c_pad, params["wx"], params["wh"], params["bias"],
        tile_h=params["tile_h"])
    return h_out[:B, :H].astype(x.dtype), c_out[:B, :H]


def _reference(x, h_in, c_in, w_i, b_i, w_h, b_h):
    gates = x @ w_i.T + b_i + h_in @ w_h.T + b_h
    H = h_in.shape[1]
    i_t = jax.nn.sigmoid(gates[:, 0 * H:1 * H])
    f_t = jax.nn.sigmoid(gates[:, 1 * H:2 * H])
    g_t = jnp.tanh(gates[:, 2 * H:3 * H])
    o_t = jax.nn.sigmoid(gates[:, 3 * H:4 * H])
    c_out = c_in * f_t + i_t * g_t
    h_out = o_t * jnp.tanh(c_out)
    return h_out, c_out


if __name__ == "__main__":
    def make_case(key, batch, input_size, hidden_size):
        std = 1.0 / (hidden_size ** 0.5)
        k = jax.random.split(key, 7)
        w_i = jax.random.uniform(k[0], (4 * hidden_size, input_size),
                                 jnp.float32, -std, std)
        b_i = jax.random.uniform(k[1], (4 * hidden_size,), jnp.float32, -std, std)
        w_h = jax.random.uniform(k[2], (4 * hidden_size, hidden_size),
                                 jnp.float32, -std, std)
        b_h = jax.random.uniform(k[3], (4 * hidden_size,), jnp.float32, -std, std)
        x = jax.random.normal(k[4], (batch, input_size), jnp.float32)
        h = jax.random.normal(k[5], (batch, hidden_size), jnp.float32)
        c = jax.random.normal(k[6], (batch, hidden_size), jnp.float32)
        return (w_i, b_i, w_h, b_h), (x, h, c)

    key = jax.random.PRNGKey(0)
    k1, k2 = jax.random.split(key)

    # --- case 1: H=32 (single hidden tile, heavy column padding) ---
    (w_i, b_i, w_h, b_h), (x, h, c) = make_case(k1, 8, 32, 32)
    h_ref, c_ref = _reference(x, h, c, w_i, b_i, w_h, b_h)

    # f32-weight path: tight tolerance (validates kernel math exactly).
    p32 = prepare_lstm_params(w_i, b_i, w_h, b_h, compute_dtype=jnp.float32)
    h_out, c_out = lstm_cell_forward(x, (h, c), p32)
    jax.block_until_ready((h_out, c_out))
    assert jnp.allclose(h_out, h_ref, atol=2e-5, rtol=2e-5)
    assert jnp.allclose(c_out, c_ref, atol=2e-5, rtol=2e-5)

    # bf16 default path (weights + x/h bf16 on the MXU, f32 everywhere else).
    p16 = prepare_lstm_params(w_i, b_i, w_h, b_h)
    h16, c16 = lstm_cell_forward(x, (h, c), p16)
    jax.block_until_ready((h16, c16))
    assert jnp.allclose(h16, h_ref, atol=5e-2, rtol=5e-2)
    assert jnp.allclose(c16, c_ref, atol=5e-2, rtol=5e-2)

    # zero initial state (h_c_in=None in the module).
    h0, c0 = lstm_cell_forward(x, None, p32)
    z = jnp.zeros_like(h)
    h0_ref, c0_ref = _reference(x, z, z, w_i, b_i, w_h, b_h)
    jax.block_until_ready((h0, c0))
    assert jnp.allclose(h0, h0_ref, atol=2e-5, rtol=2e-5)
    assert jnp.allclose(c0, c0_ref, atol=2e-5, rtol=2e-5)

    # --- case 2: H=160 -> Hp=256, 2 hidden tiles (exercises tile reorder) ---
    (w_i2, b_i2, w_h2, b_h2), (x2, h2, c2) = make_case(k2, 8, 32, 160)
    p32b = prepare_lstm_params(w_i2, b_i2, w_h2, b_h2, compute_dtype=jnp.float32)
    ho2, co2 = lstm_cell_forward(x2, (h2, c2), p32b)
    jax.block_until_ready((ho2, co2))
    h_ref2, c_ref2 = _reference(x2, h2, c2, w_i2, b_i2, w_h2, b_h2)
    assert jnp.allclose(ho2, h_ref2, atol=2e-5, rtol=2e-5)
    assert jnp.allclose(co2, c_ref2, atol=2e-5, rtol=2e-5)

    # --- multi-step recurrence on the padded fast path (no per-step pad/slice) ---
    T, B2, H2 = 4, 8, 160
    xs = jax.random.normal(jax.random.PRNGKey(3), (T, B2, 32), jnp.float32)
    hp = jnp.zeros((B2, p32b["hidden_pad"]), p32b["compute_dtype"])
    cp = jnp.zeros((B2, p32b["hidden_pad"]), jnp.float32)
    href = jnp.zeros((B2, H2), jnp.float32)
    cref = jnp.zeros((B2, H2), jnp.float32)
    for t in range(T):
        x_t = xs[t].astype(p32b["compute_dtype"])   # B2 already a multiple of 8
        hp, cp = lstm_cell_step_padded(x_t, hp, cp, p32b["wx"], p32b["wh"],
                                       p32b["bias"], tile_h=p32b["tile_h"])
        href, cref = _reference(xs[t], href, cref, w_i2, b_i2, w_h2, b_h2)
    jax.block_until_ready((hp, cp))
    assert jnp.allclose(hp[:, :H2], href, atol=1e-4, rtol=1e-4)
    assert jnp.allclose(cp[:, :H2], cref, atol=1e-4, rtol=1e-4)

    print("KERNEL_OK")
</pallas_src>

<mosaic_0001>
module attributes {stable_mosaic.version = 11 : i64} {
  func.func @_lstm_cell_kernel(%arg0: i32, %arg1: i32, %arg2: memref<8x32xf32, #tpu.memory_space<vmem>>, %arg3: memref<8x128xf32, #tpu.memory_space<vmem>>, %arg4: memref<32x512xf32, #tpu.memory_space<vmem>>, %arg5: memref<128x512xf32, #tpu.memory_space<vmem>>, %arg6: memref<1x512xf32, #tpu.memory_space<vmem>>, %arg7: memref<8x128xf32, #tpu.memory_space<vmem>>, %arg8: memref<8x128xf32, #tpu.memory_space<vmem>>, %arg9: memref<8x128xf32, #tpu.memory_space<vmem>>) attributes {dimension_semantics = [#tpu.dimension_semantics<parallel>, #tpu.dimension_semantics<parallel>], iteration_bounds = array<i64: 1, 1>, scalar_prefetch = 0 : i64, scratch_operands = 0 : i64, tpu.core_type = #tpu.core_type<tc>, window_params = [{transform_indices = @transform_0, window_bounds = array<i64: 8, 32>}, {transform_indices = @transform_1, window_bounds = array<i64: 8, 128>}, {transform_indices = @transform_2, window_bounds = array<i64: 32, 512>}, {transform_indices = @transform_3, window_bounds = array<i64: 128, 512>}, {transform_indices = @transform_4, window_bounds = array<i64: 1, 512>}, {transform_indices = @transform_5, window_bounds = array<i64: 8, 128>}, {transform_indices = @transform_6, window_bounds = array<i64: 8, 128>}, {transform_indices = @transform_7, window_bounds = array<i64: 8, 128>}]} {
    %c0 = arith.constant 0 : index
    %c0_0 = arith.constant 0 : index
    %0 = vector.load %arg2[%c0, %c0_0] : memref<8x32xf32, #tpu.memory_space<vmem>>, vector<8x32xf32>
    %c0_1 = arith.constant 0 : index
    %c0_2 = arith.constant 0 : index
    %1 = vector.load %arg4[%c0_1, %c0_2] : memref<32x512xf32, #tpu.memory_space<vmem>>, vector<32x512xf32>
    %cst = arith.constant dense<0.000000e+00> : vector<8x512xf32>
    %2 = tpu.matmul %0, %1, %cst {dimension_numbers = #tpu.dot_dimension_numbers<[1], [0], [0], [1], [0, 0, 1, 1], [], []>} : vector<8x32xf32>, vector<32x512xf32>, vector<8x512xf32> -> vector<8x512xf32>
    %c0_3 = arith.constant 0 : index
    %c0_4 = arith.constant 0 : index
    %3 = vector.load %arg3[%c0_3, %c0_4] : memref<8x128xf32, #tpu.memory_space<vmem>>, vector<8x128xf32>
    %c0_5 = arith.constant 0 : index
    %c0_6 = arith.constant 0 : index
    %4 = vector.load %arg5[%c0_5, %c0_6] : memref<128x512xf32, #tpu.memory_space<vmem>>, vector<128x512xf32>
    %cst_7 = arith.constant dense<0.000000e+00> : vector<8x512xf32>
    %5 = tpu.matmul %3, %4, %cst_7 {dimension_numbers = #tpu.dot_dimension_numbers<[1], [0], [0], [1], [0, 0, 1, 1], [], []>} : vector<8x128xf32>, vector<128x512xf32>, vector<8x512xf32> -> vector<8x512xf32>
    %6 = arith.addf %2, %5 : vector<8x512xf32>
    %c0_8 = arith.constant 0 : index
    %c0_9 = arith.constant 0 : index
    %7 = vector.load %arg6[%c0_8, %c0_9] : memref<1x512xf32, #tpu.memory_space<vmem>>, vector<1x512xf32>
    %8 = vector.broadcast %7 : vector<1x512xf32> to vector<8x512xf32>
    %9 = arith.addf %6, %8 : vector<8x512xf32>
    %10 = vector.extract_strided_slice %9 {offsets = [0, 0], sizes = [8, 128], strides = [1, 1]} : vector<8x512xf32> to vector<8x128xf32>
    %cst_10 = arith.constant 5.000000e-01 : f32
    %11 = vector.broadcast %cst_10 : f32 to vector<8x128xf32>
    %12 = arith.mulf %11, %10 : vector<8x128xf32>
    %13 = math.tanh %12 : vector<8x128xf32>
    %cst_11 = arith.constant 5.000000e-01 : f32
    %14 = vector.broadcast %cst_11 : f32 to vector<8x128xf32>
    %15 = arith.mulf %14, %13 : vector<8x128xf32>
    %cst_12 = arith.constant 5.000000e-01 : f32
    %16 = vector.broadcast %cst_12 : f32 to vector<8x128xf32>
    %17 = arith.addf %15, %16 : vector<8x128xf32>
    %18 = vector.extract_strided_slice %9 {offsets = [0, 128], sizes = [8, 128], strides = [1, 1]} : vector<8x512xf32> to vector<8x128xf32>
    %cst_13 = arith.constant 5.000000e-01 : f32
    %19 = vector.broadcast %cst_13 : f32 to vector<8x128xf32>
    %20 = arith.mulf %19, %18 : vector<8x128xf32>
    %21 = math.tanh %20 : vector<8x128xf32>
    %cst_14 = arith.constant 5.000000e-01 : f32
    %22 = vector.broadcast %cst_14 : f32 to vector<8x128xf32>
    %23 = arith.mulf %22, %21 : vector<8x128xf32>
    %cst_15 = arith.constant 5.000000e-01 : f32
    %24 = vector.broadcast %cst_15 : f32 to vector<8x128xf32>
    %25 = arith.addf %23, %24 : vector<8x128xf32>
    %26 = vector.extract_strided_slice %9 {offsets = [0, 256], sizes = [8, 128], strides = [1, 1]} : vector<8x512xf32> to vector<8x128xf32>
    %27 = math.tanh %26 : vector<8x128xf32>
    %28 = vector.extract_strided_slice %9 {offsets = [0, 384], sizes = [8, 128], strides = [1, 1]} : vector<8x512xf32> to vector<8x128xf32>
    %cst_16 = arith.constant 5.000000e-01 : f32
    %29 = vector.broadcast %cst_16 : f32 to vector<8x128xf32>
    %30 = arith.mulf %29, %28 : vector<8x128xf32>
    %31 = math.tanh %30 : vector<8x128xf32>
    %cst_17 = arith.constant 5.000000e-01 : f32
    %32 = vector.broadcast %cst_17 : f32 to vector<8x128xf32>
    %33 = arith.mulf %32, %31 : vector<8x128xf32>
    %cst_18 = arith.constant 5.000000e-01 : f32
    %34 = vector.broadcast %cst_18 : f32 to vector<8x128xf32>
    %35 = arith.addf %33, %34 : vector<8x128xf32>
    %c0_19 = arith.constant 0 : index
    %c0_20 = arith.constant 0 : index
    %36 = vector.load %arg7[%c0_19, %c0_20] : memref<8x128xf32, #tpu.memory_space<vmem>>, vector<8x128xf32>
    %37 = arith.mulf %36, %25 : vector<8x128xf32>
    %38 = arith.mulf %17, %27 : vector<8x128xf32>
    %39 = arith.addf %37, %38 : vector<8x128xf32>
    %c0_21 = arith.constant 0 : index
    %c0_22 = arith.constant 0 : index
    %40 = vector.load %arg9[%c0_21, %c0_22] : memref<8x128xf32, #tpu.memory_space<vmem>>, vector<8x128xf32>
    tpu.vector_store %arg9[%c0_21, %c0_22], %39 {strides = array<i32>} : memref<8x128xf32, #tpu.memory_space<vmem>>, vector<8x128xf32>,
    %41 = math.tanh %39 : vector<8x128xf32>
    %42 = arith.mulf %35, %41 : vector<8x128xf32>
    %c0_23 = arith.constant 0 : index
    %c0_24 = arith.constant 0 : index
    %43 = vector.load %arg8[%c0_23, %c0_24] : memref<8x128xf32, #tpu.memory_space<vmem>>, vector<8x128xf32>
    tpu.vector_store %arg8[%c0_23, %c0_24], %42 {strides = array<i32>} : memref<8x128xf32, #tpu.memory_space<vmem>>, vector<8x128xf32>,
    return
  }
  func.func @transform_0(%arg0: i32, %arg1: i32) -> (i32, i32) {
    %c0_i32 = arith.constant 0 : i32
    %c0_i32_0 = arith.constant 0 : i32
    return %arg1, %c0_i32 : i32, i32
  }
  func.func @transform_1(%arg0: i32, %arg1: i32) -> (i32, i32) {
    %c0_i32 = arith.constant 0 : i32
    %c0_i32_0 = arith.constant 0 : i32
    return %arg1, %c0_i32 : i32, i32
  }
  func.func @transform_2(%arg0: i32, %arg1: i32) -> (i32, i32) {
    %c0_i32 = arith.constant 0 : i32
    %c0_i32_0 = arith.constant 0 : i32
    return %c0_i32, %arg0 : i32, i32
  }
  func.func @transform_3(%arg0: i32, %arg1: i32) -> (i32, i32) {
    %c0_i32 = arith.constant 0 : i32
    %c0_i32_0 = arith.constant 0 : i32
    return %c0_i32, %arg0 : i32, i32
  }
  func.func @transform_4(%arg0: i32, %arg1: i32) -> (i32, i32) {
    %c0_i32 = arith.constant 0 : i32
    %c0_i32_0 = arith.constant 0 : i32
    return %c0_i32, %arg0 : i32, i32
  }
  func.func @transform_5(%arg0: i32, %arg1: i32) -> (i32, i32) {
    %c0_i32 = arith.constant 0 : i32
    return %arg1, %arg0 : i32, i32
  }
  func.func @transform_6(%arg0: i32, %arg1: i32) -> (i32, i32) {
    %c0_i32 = arith.constant 0 : i32
    return %arg1, %arg0 : i32, i32
  }
  func.func @transform_7(%arg0: i32, %arg1: i32) -> (i32, i32) {
    %c0_i32 = arith.constant 0 : i32
    return %arg1, %arg0 : i32, i32
  }
}

</mosaic_0001>

<bundles_post_ra>
// kernel: lstm_cell_step_padded.1
= control target key start
LH: loop header
LB: loop body
LE: loop exit
PB: predicated region body
PF: predicated region fallthrough
CT: control target
= control target key end

     0   :  { %13 = vsyncpa [#allocation3], 0  ;;  %s650_s0 = inlined_call_operand.vmem [shape: f32[8,32], index: 0, kind: input, shape index: {}]   ;;  %s651_s1 = inlined_call_operand.vmem [shape: f32[8,128], index: 1, kind: input, shape index: {}]   ;;  %s652_s2 = inlined_call_operand.hbm [shape: f32[32,512], index: 2, kind: input, shape index: {}]   ;;  %s653_s3 = inlined_call_operand.hbm [shape: f32[128,512], index: 3, kind: input, shape index: {}]   ;;  %s654_s4 = inlined_call_operand.hbm [shape: f32[1,512], index: 4, kind: input, shape index: {}]   ;;  %s655_s5 = inlined_call_operand.hbm [shape: f32[8,128], index: 5, kind: input, shape index: {}, may-alias: {5,7}]   ;;  %s656_s6 = inlined_call_operand.hbm [shape: f32[8,128], index: 6, kind: output, shape index: {0}]   ;;  %s657_s7 = inlined_call_operand.hbm [shape: f32[8,128], index: 7, kind: output, shape index: {1}, may-alias: {5,7}]  }
   0x1   :  { %14 = vsyncpa [#allocation6], 0 }
   0x2   :  { %15 = vsyncpa [#allocation9], 0 }
   0x3   :  { %16 = vsyncpa [#allocation4], 0 }
   0x4   :  { %17 = vsyncpa [#allocation12], 0  ;;  %s39_s26 = sshll.u32 %s653_s3, 4  ;;  %s578_s27 = smov [#allocation5]   ;;  %s40_s26 = int_to_ptr.hbm [resolvable:$true] %s39_s26 }
   0x5   :  { %s41_s28 = sshll.u32 %s578_s27, 4  ;;  %s26_s8 = sshll.u32 %s652_s2, 4  ;;  %s42_s28 = int_to_ptr.vmem [resolvable:$true] %s41_s28  ;;  %s27_s8 = int_to_ptr.hbm [resolvable:$true] %s26_s8 }
   0x6   :  { %s579_s9 = smov 512   ;;  %s580_s10 = smov 32  }
   0x7   :  { %47 = dma.hbm_to_vmem [thread:$0]  %s40_s26, 8192, %s42_s28, [#allocation6], %s579_s9, %s579_s9, %s580_s10  }
   0x8   :  { %s581_s11 = smov [#allocation2]   ;;  %s53_s15 = sshll.u32 %s654_s4, 4  ;;  %s54_s15 = int_to_ptr.hbm [resolvable:$true] %s53_s15 }
   0x9   :  { %s28_s12 = sshll.u32 %s581_s11, 4  ;;  %s64_s17 = sshll.u32 %s655_s5, 4  ;;  %s29_s12 = int_to_ptr.vmem [resolvable:$true] %s28_s12  ;;  %s65_s17 = int_to_ptr.hbm [resolvable:$true] %s64_s17 }
   0xa   :  { %34 = dma.hbm_to_vmem [thread:$0]  %s27_s8, 2048, %s29_s12, [#allocation3], %s579_s9, %s579_s9, %s580_s10  }
   0xb   :  { %s582_s18 = smov [#allocation7]   ;;  %s583_s2 = smov [#allocation8]  }
   0xc   :  { %s55_s19 = sshll.u32 %s582_s18, 4  ;;  %s66_s20 = sshll.u32 %s583_s2, 4  ;;  %s56_s19 = int_to_ptr.vmem [resolvable:$true] %s55_s19  ;;  %s67_s20 = int_to_ptr.vmem [resolvable:$true] %s66_s20 }
   0xd   :  { %58 = dma.hbm_to_vmem [thread:$0]  %s54_s15, 64, %s56_s19, [#allocation6]  }
   0xe   :  { %69 = dma.hbm_to_vmem [thread:$0]  %s65_s17, 128, %s67_s20, [#allocation9]  }
   0xf   :  { %568 = dma.done.wait [#allocation3], 2048  }
  0x10   :  { %569 = vsyncadd [#allocation3], 4294965248 }
  0x11   :  { %570 = dma.done.wait [#allocation6], 8256  }
  0x12   :  { %571 = vsyncadd [#allocation6], 4294959040 }
  0x13   :  { %572 = dma.done.wait [#allocation9], 128  }
  0x14   :  { %573 = vsyncadd [#allocation9], 4294967168  ;;  %v164_v0 = vld [vmem:[#allocation5 + $0x1e0] sm:$0xff]  ;;  %v165_v1 = vld [vmem:[#allocation5 + $0x1e8] sm:$0xff]  ;;  %vm248_vm0 = vcmask 261120   ;;  %s385_s25 = sshll.u32 %s657_s7, 4  ;;  %s386_s25 = int_to_ptr.hbm [resolvable:$true] %s385_s25 }
  0x15   :  { %v166_v2 = vld [vmem:[#allocation5 + $0x1f0] sm:$0xff]  ;;  %168 = vmatpush.msra.mxu0 %v164_v0  ;;  %188 = vmatpush.msra.mxu1 %v165_v1  ;;  %v167_v3 = vld [vmem:[#allocation5 + $0x1f8] sm:$0xff]  ;;  %v160_v4 = vld [vmem:[#allocation5 + $0x1c0] sm:$0xff]  ;;  %s585_s26 = smov [#allocation10]   ;;  %s374_s30 = sshll.u32 %s656_s6, 4  ;;  %s375_s30 = int_to_ptr.hbm [resolvable:$true] %s374_s30 }
  0x16   :  { %v161_v5 = vld [vmem:[#allocation5 + $0x1c8] sm:$0xff]  ;;  %208 = vmatpush.msra.mxu2 %v166_v2  ;;  %228 = vmatpush.msra.mxu3 %v167_v3  ;;  %v162_v6 = vld [vmem:[#allocation5 + $0x1d0] sm:$0xff]  ;;  %v163_v7 = vld [vmem:[#allocation5 + $0x1d8] sm:$0xff]  ;;  %s372_s27 = sshll.u32 %s585_s26, 4  ;;  %s373_s27 = int_to_ptr.vmem [resolvable:$true] %s372_s27 }
  0x17   :  { %v156_v8 = vld [vmem:[#allocation5 + $0x1a0] sm:$0xff]  ;;  %169 = vmatpush.msra.mxu0 %v160_v4  ;;  %189 = vmatpush.msra.mxu1 %v161_v5  ;;  %v157_v9 = vld [vmem:[#allocation5 + $0x1a8] sm:$0xff]  ;;  %v158_v10 = vld [vmem:[#allocation5 + $0x1b0] sm:$0xff] }
  0x18   :  { %v159_v11 = vld [vmem:[#allocation5 + $0x1b8] sm:$0xff]  ;;  %209 = vmatpush.msra.mxu2 %v162_v6  ;;  %229 = vmatpush.msra.mxu3 %v163_v7  ;;  %v152_v12 = vld [vmem:[#allocation5 + $0x180] sm:$0xff]  ;;  %v153_v13 = vld [vmem:[#allocation5 + $0x188] sm:$0xff] }
  0x19   :  { %170 = vmatpush.msra.mxu0 %v156_v8  ;;  %190 = vmatpush.msra.mxu1 %v157_v9  ;;  %v154_v14 = vld [vmem:[#allocation5 + $0x190] sm:$0xff]  ;;  %v155_v15 = vld [vmem:[#allocation5 + $0x198] sm:$0xff]  ;;  %v148_v16 = vld [vmem:[#allocation5 + $0x160] sm:$0xff] }
  0x1a   :  { %210 = vmatpush.msra.mxu2 %v158_v10  ;;  %230 = vmatpush.msra.mxu3 %v159_v11  ;;  %v149_v17 = vld [vmem:[#allocation5 + $0x168] sm:$0xff]  ;;  %v150_v18 = vld [vmem:[#allocation5 + $0x170] sm:$0xff]  ;;  %v151_v19 = vld [vmem:[#allocation5 + $0x178] sm:$0xff] }
  0x1b   :  { %171 = vmatpush.msra.mxu0 %v152_v12  ;;  %191 = vmatpush.msra.mxu1 %v153_v13  ;;  %v144_v20 = vld [vmem:[#allocation5 + $0x140] sm:$0xff]  ;;  %v145_v21 = vld [vmem:[#allocation5 + $0x148] sm:$0xff]  ;;  %v146_v22 = vld [vmem:[#allocation5 + $0x150] sm:$0xff] }
  0x1c   :  { %211 = vmatpush.msra.mxu2 %v154_v14  ;;  %231 = vmatpush.msra.mxu3 %v155_v15  ;;  %v147_v23 = vld [vmem:[#allocation5 + $0x158] sm:$0xff]  ;;  %v140_v24 = vld [vmem:[#allocation5 + $0x120] sm:$0xff]  ;;  %v141_v25 = vld [vmem:[#allocation5 + $0x128] sm:$0xff] }
  0x1d   :  { %172 = vmatpush.msra.mxu0 %v148_v16  ;;  %192 = vmatpush.msra.mxu1 %v149_v17  ;;  %v142_v26 = vld [vmem:[#allocation5 + $0x130] sm:$0xff]  ;;  %v143_v27 = vld [vmem:[#allocation5 + $0x138] sm:$0xff]  ;;  %v136_v28 = vld [vmem:[#allocation5 + $0x100] sm:$0xff] }
  0x1e   :  { %212 = vmatpush.msra.mxu2 %v150_v18  ;;  %232 = vmatpush.msra.mxu3 %v151_v19  ;;  %v137_v29 = vld [vmem:[#allocation5 + $0x108] sm:$0xff]  ;;  %v138_v30 = vld [vmem:[#allocation5 + $0x110] sm:$0xff]  ;;  %v139_v31 = vld [vmem:[#allocation5 + $0x118] sm:$0xff] }
  0x1f   :  { %173 = vmatpush.msra.mxu0 %v144_v20  ;;  %193 = vmatpush.msra.mxu1 %v145_v21  ;;  %v132_v32 = vld [vmem:[#allocation5 + $0xe0] sm:$0xff]  ;;  %v133_v33 = vld [vmem:[#allocation5 + $0xe8] sm:$0xff]  ;;  %v134_v34 = vld [vmem:[#allocation5 + $0xf0] sm:$0xff] }
  0x20   :  { %213 = vmatpush.msra.mxu2 %v146_v22  ;;  %233 = vmatpush.msra.mxu3 %v147_v23  ;;  %v135_v35 = vld [vmem:[#allocation5 + $0xf8] sm:$0xff]  ;;  %v128_v36 = vld [vmem:[#allocation5 + $0xc0] sm:$0xff]  ;;  %v129_v37 = vld [vmem:[#allocation5 + $0xc8] sm:$0xff] }
  0x21   :  { %174 = vmatpush.msra.mxu0 %v140_v24  ;;  %194 = vmatpush.msra.mxu1 %v141_v25  ;;  %v130_v38 = vld [vmem:[#allocation5 + $0xd0] sm:$0xff]  ;;  %v131_v39 = vld [vmem:[#allocation5 + $0xd8] sm:$0xff]  ;;  %v124_v40 = vld [vmem:[#allocation5 + $0xa0] sm:$0xff] }
  0x22   :  { %214 = vmatpush.msra.mxu2 %v142_v26  ;;  %234 = vmatpush.msra.mxu3 %v143_v27  ;;  %v125_v41 = vld [vmem:[#allocation5 + $0xa8] sm:$0xff]  ;;  %v126_v42 = vld [vmem:[#allocation5 + $0xb0] sm:$0xff]  ;;  %v127_v43 = vld [vmem:[#allocation5 + $0xb8] sm:$0xff] }
  0x23   :  { %175 = vmatpush.msra.mxu0 %v136_v28  ;;  %195 = vmatpush.msra.mxu1 %v137_v29  ;;  %v120_v44 = vld [vmem:[#allocation5 + $0x80] sm:$0xff]  ;;  %v121_v45 = vld [vmem:[#allocation5 + $0x88] sm:$0xff]  ;;  %v122_v46 = vld [vmem:[#allocation5 + $0x90] sm:$0xff] }
  0x24   :  { %215 = vmatpush.msra.mxu2 %v138_v30  ;;  %235 = vmatpush.msra.mxu3 %v139_v31  ;;  %v123_v47 = vld [vmem:[#allocation5 + $0x98] sm:$0xff]  ;;  %v116_v48 = vld [vmem:[#allocation5 + $0x60] sm:$0xff]  ;;  %v117_v49 = vld [vmem:[#allocation5 + $0x68] sm:$0xff] }
  0x25   :  { %176 = vmatpush.msra.mxu0 %v132_v32  ;;  %196 = vmatpush.msra.mxu1 %v133_v33  ;;  %v118_v50 = vld [vmem:[#allocation5 + $0x70] sm:$0xff]  ;;  %v119_v51 = vld [vmem:[#allocation5 + $0x78] sm:$0xff]  ;;  %v112_v52 = vld [vmem:[#allocation5 + $0x40] sm:$0xff] }
  0x26   :  { %216 = vmatpush.msra.mxu2 %v134_v34  ;;  %236 = vmatpush.msra.mxu3 %v135_v35  ;;  %v113_v53 = vld [vmem:[#allocation5 + $0x48] sm:$0xff]  ;;  %v114_v54 = vld [vmem:[#allocation5 + $0x50] sm:$0xff]  ;;  %v115_v55 = vld [vmem:[#allocation5 + $0x58] sm:$0xff] }
  0x27   :  { %177 = vmatpush.msra.mxu0 %v128_v36  ;;  %197 = vmatpush.msra.mxu1 %v129_v37  ;;  %v108_v56 = vld [vmem:[#allocation5 + $0x20] sm:$0xff]  ;;  %v109_v57 = vld [vmem:[#allocation5 + $0x28] sm:$0xff]  ;;  %v110_v58 = vld [vmem:[#allocation5 + $0x30] sm:$0xff] }
  0x28   :  { %217 = vmatpush.msra.mxu2 %v130_v38  ;;  %237 = vmatpush.msra.mxu3 %v131_v39  ;;  %v111_v59 = vld [vmem:[#allocation5 + $0x38] sm:$0xff]  ;;  %v104_v60 = vld [vmem:[#allocation5] sm:$0xff]  ;;  %v105_v61 = vld [vmem:[#allocation5 + $0x8] sm:$0xff] }
  0x29   :  { %178 = vmatpush.msra.mxu0 %v124_v40  ;;  %198 = vmatpush.msra.mxu1 %v125_v41  ;;  %v106_v62 = vld [vmem:[#allocation5 + $0x10] sm:$0xff]  ;;  %v107_v63 = vld [vmem:[#allocation5 + $0x18] sm:$0xff]  ;;  %v103_v0 = vld [vmem:[%s651_s1] sm:$0xff] }
  0x2a   :  { %218 = vmatpush.msra.mxu2 %v126_v42  ;;  %238 = vmatpush.msra.mxu3 %v127_v43  ;;  %v99_v1 = vld [vmem:[#allocation2 + $0x60] sm:$0xff]  ;;  %v100_v2 = vld [vmem:[#allocation2 + $0x68] sm:$0xff]  ;;  %v101_v3 = vld [vmem:[#allocation2 + $0x70] sm:$0xff] }
  0x2b   :  { %179 = vmatpush.msra.mxu0 %v120_v44  ;;  %199 = vmatpush.msra.mxu1 %v121_v45  ;;  %v102_v4 = vld [vmem:[#allocation2 + $0x78] sm:$0xff]  ;;  %v95_v5 = vld [vmem:[#allocation2 + $0x40] sm:$0xff]  ;;  %v96_v6 = vld [vmem:[#allocation2 + $0x48] sm:$0xff] }
  0x2c   :  { %219 = vmatpush.msra.mxu2 %v122_v46  ;;  %239 = vmatpush.msra.mxu3 %v123_v47  ;;  %v97_v7 = vld [vmem:[#allocation2 + $0x50] sm:$0xff]  ;;  %v98_v8 = vld [vmem:[#allocation2 + $0x58] sm:$0xff]  ;;  %v91_v9 = vld [vmem:[#allocation2 + $0x20] sm:$0xff] }
  0x2d   :  { %180 = vmatpush.msra.mxu0 %v116_v48  ;;  %200 = vmatpush.msra.mxu1 %v117_v49  ;;  %v92_v10 = vld [vmem:[#allocation2 + $0x28] sm:$0xff]  ;;  %v93_v11 = vld [vmem:[#allocation2 + $0x30] sm:$0xff]  ;;  %v94_v12 = vld [vmem:[#allocation2 + $0x38] sm:$0xff] }
  0x2e   :  { %220 = vmatpush.msra.mxu2 %v118_v50  ;;  %240 = vmatpush.msra.mxu3 %v119_v51  ;;  %v87_v13 = vld [vmem:[#allocation2] sm:$0xff]  ;;  %v88_v14 = vld [vmem:[#allocation2 + $0x8] sm:$0xff]  ;;  %v89_v15 = vld [vmem:[#allocation2 + $0x10] sm:$0xff] }
  0x2f   :  { %181 = vmatpush.msra.mxu0 %v112_v52  ;;  %201 = vmatpush.msra.mxu1 %v113_v53  ;;  %v90_v16 = vld [vmem:[#allocation2 + $0x18] sm:$0xff]  ;;  %v86_v17 = vld [vmem:[%s650_s0] sm:$0xff]  ;;  %s584_s0 = smov [#allocation11]  }
  0x30   :  { %221 = vmatpush.msra.mxu2 %v114_v54  ;;  %241 = vmatpush.msra.mxu3 %v115_v55  ;;  %v332_v20 = vld [vmem:[#allocation7] sm:$0xf]  ;;  %v359_v47 = vld [vmem:[#allocation8] sm:$0xff]  ;;  %s383_s22 = sshll.u32 %s584_s0, 4  ;;  %s384_s22 = int_to_ptr.vmem [resolvable:$true] %s383_s22 }
  0x31   :  { %182 = vmatpush.msra.mxu0 %v108_v56  ;;  %202 = vmatpush.msra.mxu1 %v109_v57  ;;  %v334_v23 = vperm.slane %v332_v20, 0  ;;  %v335_v24 = vperm.slane %v332_v20, 1  ;;  %v336_v33 = vperm.slane %v332_v20, 2  ;;  %v337_v34 = vperm.slane %v332_v20, 3 }
  0x32   :  { %222 = vmatpush.msra.mxu2 %v110_v58  ;;  %242 = vmatpush.msra.mxu3 %v111_v59 }
  0x33   :  { %183 = vmatpush.msra.mxu0 %v104_v60  ;;  %203 = vmatpush.msra.mxu1 %v105_v61 }
  0x34   :  { %223 = vmatpush.msra.mxu2 %v106_v62  ;;  %243 = vmatpush.msra.mxu3 %v107_v63 }
  0x35   :  { %184 = vmatmul.f32.vlgmr.msra.gmra.mxu0 %v103_v0  ;;  %204 = vmatmul.f32.vlgmr.msra.gmra.mxu1 %v103_v0 }
  0x36   :  { %224 = vmatmul.f32.vlgmr.msra.gmra.mxu2 %v103_v0  ;;  %244 = vmatmul.f32.vlgmr.msra.gmra.mxu3 %v103_v0 }
  0x37   :  { %264 = vmatpush.msrb.mxu0 %v99_v1  ;;  %284 = vmatpush.msrb.mxu1 %v100_v2 }
  0x38   :  { %304 = vmatpush.msrb.mxu2 %v101_v3  ;;  %324 = vmatpush.msrb.mxu3 %v102_v4 }
  0x39   :  { %265 = vmatpush.msrb.mxu0 %v95_v5  ;;  %285 = vmatpush.msrb.mxu1 %v96_v6 }
  0x3a   :  { %305 = vmatpush.msrb.mxu2 %v97_v7  ;;  %325 = vmatpush.msrb.mxu3 %v98_v8 }
  0x3b   :  { %266 = vmatpush.msrb.mxu0 %v91_v9  ;;  %286 = vmatpush.msrb.mxu1 %v92_v10 }
  0x3c   :  { %306 = vmatpush.msrb.mxu2 %v93_v11  ;;  %326 = vmatpush.msrb.mxu3 %v94_v12 }
  0x3d   :  { %267 = vmatpush.msrb.mxu0 %v87_v13  ;;  %287 = vmatpush.msrb.mxu1 %v88_v14 }
  0x3e   :  { %307 = vmatpush.msrb.mxu2 %v89_v15  ;;  %327 = vmatpush.msrb.mxu3 %v90_v16 }
  0x3f   :  { %402 = vmatmul.msk.f32.vlgmr.msrb.gmra.mxu0 %vm248_vm0, %v86_v17  ;;  %403 = vmatmul.msk.f32.vlgmr.msrb.gmra.mxu1 %vm248_vm0, %v86_v17 }
  0x40   :  { %404 = vmatmul.msk.f32.vlgmr.msrb.gmra.mxu2 %vm248_vm0, %v86_v17  ;;  %405 = vmatmul.msk.f32.vlgmr.msrb.gmra.mxu3 %vm248_vm0, %v86_v17 }
  0xb2   :  { %v185_v18 = vpop.f32.mrf.mxu0  ;;  %v205_v19 = vpop.f32.mrf.mxu1 }
  0xb9   :  { %v225_v21 = vpop.f32.mrf.mxu2  ;;  %v245_v22 = vpop.f32.mrf.mxu3 }
  0xbc   :  { %v269_v25 = vpop.f32.mrf.mxu0  ;;  %v289_v26 = vpop.f32.mrf.mxu1 }
  0xbd   :  { %v270_v27 = vadd.f32 %v269_v25, %v185_v18  ;;  %v290_v28 = vadd.f32 %v289_v26, %v205_v19 }
  0xbf   :  { %v342_v29 = vadd.f32 %v334_v23, %v270_v27  ;;  %v343_v30 = vadd.f32 %v335_v24, %v290_v28 }
  0xc1   :  { %v346_v31 = vmul.f32 0.5, %v342_v29  ;;  %v350_v32 = vmul.f32 0.5, %v343_v30 }
  0xc3   :  { %414 = vtanh.f32 %v346_v31  ;;  %v309_v35 = vpop.f32.mrf.mxu2  ;;  %v329_v36 = vpop.f32.mrf.mxu3 }
  0xc4   :  { %416 = vtanh.f32 %v350_v32  ;;  %v310_v37 = vadd.f32 %v309_v35, %v225_v21  ;;  %v330_v38 = vadd.f32 %v329_v36, %v245_v22 }
  0xc6   :  { %v344_v39 = vadd.f32 %v336_v33, %v310_v37  ;;  %v345_v40 = vadd.f32 %v337_v34, %v330_v38 }
  0xc8   :  { %418 = vtanh.f32 %v344_v39  ;;  %v355_v41 = vmul.f32 0.5, %v345_v40 }
  0xc9   :  { %v415_v42 = vpop.eup %414 }
  0xca   :  { %v417_v43 = vpop.eup %416  ;;  %v348_v44 = vmul.f32 0.5, %v415_v42  ;;  %420 = vtanh.f32 %v355_v41 }
  0xcb   :  { %v352_v45 = vmul.f32 0.5, %v417_v43 }
  0xcc   :  { %v349_v46 = vadd.f32 0.5, %v348_v44 }
  0xcd   :  { %v353_v48 = vadd.f32 0.5, %v352_v45 }
  0xce   :  { %v419_v49 = vpop.eup %418 }
  0xcf   :  { %v360_v50 = vmul.f32 %v359_v47, %v353_v48  ;;  %v361_v51 = vmul.f32 %v419_v49, %v349_v46 }
  0xd0   :  { %v421_v52 = vpop.eup %420 }
  0xd1   :  { %v362_v53 = vadd.f32 %v361_v51, %v360_v50  ;;  %v357_v54 = vmul.f32 0.5, %v421_v52 }
  0xd3   :  { %363 = vst [vmem:[#allocation11] sm:$0xff] %v362_v53  ;;  %422 = vtanh.f32 %v362_v53  ;;  %v358_v55 = vadd.f32 0.5, %v357_v54 }
  0xd4   :  { %388 = dma.vmem_to_hbm [thread:$0]  %s384_s22, 128, %s386_s25, [#allocation12]  }
  0xd9   :  { %v423_v56 = vpop.eup %422 }
  0xda   :  { %v365_v57 = vmul.f32 %v423_v56, %v358_v55 }
  0xdc   :  { %366 = vst [vmem:[#allocation10] sm:$0xff] %v365_v57 }
  0xdd   :  { %377 = dma.vmem_to_hbm [thread:$0]  %s373_s27, 128, %s375_s30, [#allocation4]  }
  0xde   :  { %574 = dma.done.wait [#allocation4], 128  }
  0xdf   :  { %575 = vsyncadd [#allocation4], 4294967168 }
  0xe0   :  { %576 = dma.done.wait [#allocation12], 128  }
  0xe1   :  { %577 = vsyncadd [#allocation12], 4294967168 }
  0xe2   :  { %397 = vsyncpa [#allocation3], 1 }
  0xe3   :  { %398 = vsyncpa [#allocation6], 1 }
  0xe4   :  { %399 = vsyncpa [#allocation9], 1 }
  0xe5   :  { %400 = vsyncpa [#allocation4], 1 }
  0xe6   :  { %401 = vsyncpa [#allocation12], 1 }

</bundles_post_ra>
